<compile_context>
chip_gen: v6e
topology: v6e:2x2x1
jax: 0.10.0
libtpu: 0.0.40
codegen_flags: <defaults>
</compile_context>

<pallas_src>
import jax
import jax.numpy as jnp
from jax import lax
from jax.experimental import pallas as pl
from jax.experimental.pallas import tpu as pltpu

KERNEL_SIZE = 5
DROPOUT = 0.2  # unused at inference time


# ---------------------------------------------------------------------------
# Fused whole-network Pallas kernel (factory closes over static layer meta).
# ---------------------------------------------------------------------------
def _make_fused_tcn_kernel(layer_meta, *, B, L, K):
    """layer_meta: static tuple of (cin, cout, dilation, has_res) per layer."""
    BL = B * L

    def _causal_shift(x, shift, rows):
        # result[:, t] = x[:, t - shift] within each length-L batch block,
        # zero for the first `shift` positions of each block (causal left pad).
        if shift == 0:
            return x
        rolled = pltpu.roll(x, shift=shift, axis=1)          # XLU lane rotate
        t_local = jax.lax.broadcasted_iota(jnp.int32, (rows, BL), 1) % L
        return jnp.where(t_local >= shift, rolled, 0.0)

    def _causal_conv(x, w_ref, b_ref, cin, dilation):
        # x: (cin, B*L);  w_ref: (cout, K*cin);  b_ref: (cout, 1)
        taps = [_causal_shift(x, (K - 1 - k) * dilation, cin) for k in range(K)]
        slab = jnp.concatenate(taps, axis=0)                 # (K*cin, B*L)
        y = jnp.dot(w_ref[...], slab, preferred_element_type=jnp.float32)
        return y + b_ref[...]

    def kernel(x_ref, *refs):
        o_ref = refs[-1]
        params = refs[:-1]

        # (B, Cin, L) -> (Cin, B*L): fold batch into the lane axis.
        h = jnp.concatenate([x_ref[b].astype(jnp.float32) for b in range(B)],
                            axis=-1)

        p = 0
        for cin, cout, dilation, has_res in layer_meta:
            w1, b1, w2, b2 = params[p:p + 4]
            p += 4
            a = jnp.maximum(_causal_conv(h, w1, b1, cin, dilation), 0.0)
            y = jnp.maximum(_causal_conv(a, w2, b2, cout, dilation), 0.0)
            if has_res:                                      # 1x1 residual conv
                wres, bres = params[p:p + 2]
                p += 2
                res = jnp.dot(wres[...], h,
                              preferred_element_type=jnp.float32) + bres[...]
            else:
                res = h
            h = jnp.maximum(y + res, 0.0)

        # (Cout, B*L) -> (B, Cout, L); static, 128-lane-aligned slices.
        for b in range(B):
            o_ref[b] = h[:, b * L:(b + 1) * L].astype(o_ref.dtype)

    return kernel


# ---------------------------------------------------------------------------
# Wrapper: the full TemporalConvolutionNetwork in a single pallas_call.
# ---------------------------------------------------------------------------
def tcn_forward(x_ncl, layer_params, dilations, K=KERNEL_SIZE):
    """x_ncl: (B, C_in, L) float32 (PyTorch NCL) -> (B, C_out, L)."""
    B, in_ch, L = x_ncl.shape

    flat, meta = [], []
    for (w1p, b1, w2p, b2, wres, bres), d in zip(layer_params, dilations):
        out_ch = w1p.shape[0]
        has_res = wres is not None
        flat.extend([w1p, b1, w2p, b2])
        if has_res:
            flat.extend([wres, bres])
        meta.append((in_ch, out_ch, d, has_res))
        in_ch = out_ch

    kern = _make_fused_tcn_kernel(tuple(meta), B=B, L=L, K=K)
    vmem_spec = pl.BlockSpec(memory_space=pltpu.MemorySpace.VMEM)

    return pl.pallas_call(
        kern,
        out_shape=jax.ShapeDtypeStruct((B, in_ch, L), x_ncl.dtype),
        in_specs=[vmem_spec] * (1 + len(flat)),
        out_specs=vmem_spec,
    )(x_ncl, *flat)


# ---------------------------------------------------------------------------
# Pure-JAX reference (PyTorch semantics) for verification.
# ---------------------------------------------------------------------------
def _ref_causal_conv(x_ncl, w_oik, b, dilation):
    K = w_oik.shape[-1]
    pad = (K - 1) * dilation
    y = lax.conv_general_dilated(
        x_ncl, w_oik, window_strides=(1,), padding=[(pad, 0)],
        rhs_dilation=(dilation,), dimension_numbers=('NCH', 'OIH', 'NCH'))
    return y + b[None, :, None]


def ref_tcn(x_ncl, torch_layer_params, dilations):
    h = x_ncl
    for (w1, b1, w2, b2, wres, bres), d in zip(torch_layer_params, dilations):
        a = jax.nn.relu(_ref_causal_conv(h, w1, b1, d))
        y = jax.nn.relu(_ref_causal_conv(a, w2, b2, d))
        if wres is None:
            res = h
        else:
            res = lax.conv_general_dilated(
                h, wres, (1,), [(0, 0)],
                dimension_numbers=('NCH', 'OIH', 'NCH')) + bres[None, :, None]
        h = jax.nn.relu(y + res)
    return h


# ---------------------------------------------------------------------------
# Deterministic parameter construction (mirrors __init__ shapes + weight_norm).
# ---------------------------------------------------------------------------
def _weight_norm_effective(v, g):
    # v: (Cout, Cin, K), g: (Cout,)  ->  g * v / ||v||  (norm over dims 1,2)
    nrm = jnp.sqrt(jnp.sum(v * v, axis=(1, 2), keepdims=True))
    return g[:, None, None] * v / nrm


def _pack_im2col_weight(w_oik):
    # (Cout, Cin, K) -> (Cout, K*Cin) with column index = k*Cin + c,
    # matching the tap-major / channel-minor im2col slab built in the kernel.
    cout, cin, K = w_oik.shape
    return jnp.transpose(w_oik, (0, 2, 1)).reshape(cout, K * cin)


def build_params(key, num_inputs, num_channels, K):
    torch_params, kern_params, dilations = [], [], []
    in_ch = num_inputs
    for i, out_ch in enumerate(num_channels):
        dilation = 2 ** i
        key, *ks = jax.random.split(key, 9)
        v1 = 0.1 * jax.random.normal(ks[0], (out_ch, in_ch, K), jnp.float32)
        g1 = 1.0 + 0.1 * jax.random.normal(ks[1], (out_ch,), jnp.float32)
        w1 = _weight_norm_effective(v1, g1)
        b1 = 0.1 * jax.random.normal(ks[2], (out_ch,), jnp.float32)

        v2 = 0.1 * jax.random.normal(ks[3], (out_ch, out_ch, K), jnp.float32)
        g2 = 1.0 + 0.1 * jax.random.normal(ks[4], (out_ch,), jnp.float32)
        w2 = _weight_norm_effective(v2, g2)
        b2 = 0.1 * jax.random.normal(ks[5], (out_ch,), jnp.float32)

        if in_ch != out_ch:
            wres = 0.1 * jax.random.normal(ks[6], (out_ch, in_ch, 1), jnp.float32)
            bres = 0.1 * jax.random.normal(ks[7], (out_ch,), jnp.float32)
        else:
            wres = bres = None

        torch_params.append((w1, b1, w2, b2, wres, bres))
        kern_params.append((
            _pack_im2col_weight(w1),                           # (Cout, K*Cin)
            b1[:, None],                                       # (Cout, 1)
            _pack_im2col_weight(w2),                           # (Cout, K*Cout)
            b2[:, None],
            None if wres is None else wres[:, :, 0],           # (Cout, Cin)
            None if bres is None else bres[:, None],           # (Cout, 1)
        ))
        dilations.append(dilation)
        in_ch = out_ch
    return torch_params, kern_params, dilations


if __name__ == "__main__":
    key = jax.random.PRNGKey(0)
    key_x, key_p = jax.random.split(key)

    B, L = 2, 128
    num_inputs = 8
    num_channels = (16, 16)           # two levels: dilations 1 and 2
    K = KERNEL_SIZE

    x = jax.random.normal(key_x, (B, num_inputs, L), jnp.float32)  # NCL, like PyTorch
    torch_params, kern_params, dilations = build_params(
        key_p, num_inputs, num_channels, K)

    out = tcn_forward(x, kern_params, dilations)
    out = jax.block_until_ready(out)

    ref = ref_tcn(x, torch_params, dilations)
    assert out.shape == (B, num_channels[-1], L)
    assert jnp.allclose(out, ref, rtol=1e-4, atol=1e-4), (
        f"max abs err {jnp.max(jnp.abs(out - ref))}")

    print("KERNEL_OK")
</pallas_src>

<mosaic_0001>
module attributes {stable_mosaic.version = 11 : i64} {
  func.func @kernel(%arg0: memref<2x8x128xf32, #tpu.memory_space<vmem>>, %arg1: memref<16x40xf32, #tpu.memory_space<vmem>>, %arg2: memref<16x1xf32, #tpu.memory_space<vmem>>, %arg3: memref<16x80xf32, #tpu.memory_space<vmem>>, %arg4: memref<16x1xf32, #tpu.memory_space<vmem>>, %arg5: memref<16x8xf32, #tpu.memory_space<vmem>>, %arg6: memref<16x1xf32, #tpu.memory_space<vmem>>, %arg7: memref<16x80xf32, #tpu.memory_space<vmem>>, %arg8: memref<16x1xf32, #tpu.memory_space<vmem>>, %arg9: memref<16x80xf32, #tpu.memory_space<vmem>>, %arg10: memref<16x1xf32, #tpu.memory_space<vmem>>, %arg11: memref<2x16x128xf32, #tpu.memory_space<vmem>>) attributes {dimension_semantics = [], scalar_prefetch = 0 : i64, scratch_operands = 0 : i64, tpu.core_type = #tpu.core_type<tc>} {
    %c0 = arith.constant 0 : index
    %c0_0 = arith.constant 0 : index
    %c0_1 = arith.constant 0 : index
    %0 = vector.load %arg0[%c0, %c0_0, %c0_1] : memref<2x8x128xf32, #tpu.memory_space<vmem>>, vector<1x8x128xf32>
    %1 = vector.shape_cast %0 : vector<1x8x128xf32> to vector<8x128xf32>
    %c1 = arith.constant 1 : index
    %c0_2 = arith.constant 0 : index
    %c0_3 = arith.constant 0 : index
    %2 = vector.load %arg0[%c1, %c0_2, %c0_3] : memref<2x8x128xf32, #tpu.memory_space<vmem>>, vector<1x8x128xf32>
    %3 = vector.shape_cast %2 : vector<1x8x128xf32> to vector<8x128xf32>
    %4 = tpu.concatenate %1, %3 in 1 : vector<8x128xf32>, vector<8x128xf32> -> vector<8x256xf32>
    %c4_i32 = arith.constant 4 : i32
    %5 = tpu.dynamic_rotate %4 by %c4_i32 dim 1 : vector<8x256xf32>, i32 -> vector<8x256xf32>
    %6 = tpu.iota {dimensions = array<i32: 1>} : vector<8x256xi32>
    %c128_i32 = arith.constant 128 : i32
    %c0_i32 = arith.constant 0 : i32
    %7 = arith.cmpi eq, %c128_i32, %c0_i32 : i32
    %c1_i32 = arith.constant 1 : i32
    %8 = arith.select %7, %c1_i32, %c128_i32 : i32
    %9 = vector.broadcast %8 : i32 to vector<8x256xi32>
    %10 = arith.remsi %6, %9 : vector<8x256xi32>
    %c0_i32_4 = arith.constant 0 : i32
    %11 = vector.broadcast %c0_i32_4 : i32 to vector<8x256xi32>
    %12 = arith.cmpi ne, %10, %11 : vector<8x256xi32>
    %c0_i32_5 = arith.constant 0 : i32
    %13 = vector.broadcast %c0_i32_5 : i32 to vector<8x256xi32>
    %14 = arith.cmpi slt, %10, %13 : vector<8x256xi32>
    %c0_i32_6 = arith.constant 0 : i32
    %15 = arith.cmpi slt, %8, %c0_i32_6 : i32
    %16 = vector.broadcast %15 : i1 to vector<8x256xi1>
    %17 = vector.broadcast %16 : vector<8x256xi1> to vector<8x256xi1>
    %18 = arith.xori %14, %17 : vector<8x256xi1>
    %19 = arith.andi %18, %12 : vector<8x256xi1>
    %20 = vector.broadcast %8 : i32 to vector<8x256xi32>
    %21 = arith.addi %10, %20 : vector<8x256xi32>
    %22 = arith.select %19, %21, %10 : vector<8x256xi1>, vector<8x256xi32>
    %c4_i32_7 = arith.constant 4 : i32
    %23 = vector.broadcast %c4_i32_7 : i32 to vector<8x256xi32>
    %24 = arith.cmpi sge, %22, %23 : vector<8x256xi32>
    %cst = arith.constant 0.000000e+00 : f32
    %25 = vector.broadcast %cst : f32 to vector<8x256xf32>
    %26 = arith.select %24, %5, %25 : vector<8x256xi1>, vector<8x256xf32>
    %c3_i32 = arith.constant 3 : i32
    %27 = tpu.dynamic_rotate %4 by %c3_i32 dim 1 : vector<8x256xf32>, i32 -> vector<8x256xf32>
    %28 = tpu.iota {dimensions = array<i32: 1>} : vector<8x256xi32>
    %c128_i32_8 = arith.constant 128 : i32
    %c0_i32_9 = arith.constant 0 : i32
    %29 = arith.cmpi eq, %c128_i32_8, %c0_i32_9 : i32
    %c1_i32_10 = arith.constant 1 : i32
    %30 = arith.select %29, %c1_i32_10, %c128_i32_8 : i32
    %31 = vector.broadcast %30 : i32 to vector<8x256xi32>
    %32 = arith.remsi %28, %31 : vector<8x256xi32>
    %c0_i32_11 = arith.constant 0 : i32
    %33 = vector.broadcast %c0_i32_11 : i32 to vector<8x256xi32>
    %34 = arith.cmpi ne, %32, %33 : vector<8x256xi32>
    %c0_i32_12 = arith.constant 0 : i32
    %35 = vector.broadcast %c0_i32_12 : i32 to vector<8x256xi32>
    %36 = arith.cmpi slt, %32, %35 : vector<8x256xi32>
    %c0_i32_13 = arith.constant 0 : i32
    %37 = arith.cmpi slt, %30, %c0_i32_13 : i32
    %38 = vector.broadcast %37 : i1 to vector<8x256xi1>
    %39 = vector.broadcast %38 : vector<8x256xi1> to vector<8x256xi1>
    %40 = arith.xori %36, %39 : vector<8x256xi1>
    %41 = arith.andi %40, %34 : vector<8x256xi1>
    %42 = vector.broadcast %30 : i32 to vector<8x256xi32>
    %43 = arith.addi %32, %42 : vector<8x256xi32>
    %44 = arith.select %41, %43, %32 : vector<8x256xi1>, vector<8x256xi32>
    %c3_i32_14 = arith.constant 3 : i32
    %45 = vector.broadcast %c3_i32_14 : i32 to vector<8x256xi32>
    %46 = arith.cmpi sge, %44, %45 : vector<8x256xi32>
    %cst_15 = arith.constant 0.000000e+00 : f32
    %47 = vector.broadcast %cst_15 : f32 to vector<8x256xf32>
    %48 = arith.select %46, %27, %47 : vector<8x256xi1>, vector<8x256xf32>
    %c2_i32 = arith.constant 2 : i32
    %49 = tpu.dynamic_rotate %4 by %c2_i32 dim 1 : vector<8x256xf32>, i32 -> vector<8x256xf32>
    %50 = tpu.iota {dimensions = array<i32: 1>} : vector<8x256xi32>
    %c128_i32_16 = arith.constant 128 : i32
    %c0_i32_17 = arith.constant 0 : i32
    %51 = arith.cmpi eq, %c128_i32_16, %c0_i32_17 : i32
    %c1_i32_18 = arith.constant 1 : i32
    %52 = arith.select %51, %c1_i32_18, %c128_i32_16 : i32
    %53 = vector.broadcast %52 : i32 to vector<8x256xi32>
    %54 = arith.remsi %50, %53 : vector<8x256xi32>
    %c0_i32_19 = arith.constant 0 : i32
    %55 = vector.broadcast %c0_i32_19 : i32 to vector<8x256xi32>
    %56 = arith.cmpi ne, %54, %55 : vector<8x256xi32>
    %c0_i32_20 = arith.constant 0 : i32
    %57 = vector.broadcast %c0_i32_20 : i32 to vector<8x256xi32>
    %58 = arith.cmpi slt, %54, %57 : vector<8x256xi32>
    %c0_i32_21 = arith.constant 0 : i32
    %59 = arith.cmpi slt, %52, %c0_i32_21 : i32
    %60 = vector.broadcast %59 : i1 to vector<8x256xi1>
    %61 = vector.broadcast %60 : vector<8x256xi1> to vector<8x256xi1>
    %62 = arith.xori %58, %61 : vector<8x256xi1>
    %63 = arith.andi %62, %56 : vector<8x256xi1>
    %64 = vector.broadcast %52 : i32 to vector<8x256xi32>
    %65 = arith.addi %54, %64 : vector<8x256xi32>
    %66 = arith.select %63, %65, %54 : vector<8x256xi1>, vector<8x256xi32>
    %c2_i32_22 = arith.constant 2 : i32
    %67 = vector.broadcast %c2_i32_22 : i32 to vector<8x256xi32>
    %68 = arith.cmpi sge, %66, %67 : vector<8x256xi32>
    %cst_23 = arith.constant 0.000000e+00 : f32
    %69 = vector.broadcast %cst_23 : f32 to vector<8x256xf32>
    %70 = arith.select %68, %49, %69 : vector<8x256xi1>, vector<8x256xf32>
    %c1_i32_24 = arith.constant 1 : i32
    %71 = tpu.dynamic_rotate %4 by %c1_i32_24 dim 1 : vector<8x256xf32>, i32 -> vector<8x256xf32>
    %72 = tpu.iota {dimensions = array<i32: 1>} : vector<8x256xi32>
    %c128_i32_25 = arith.constant 128 : i32
    %c0_i32_26 = arith.constant 0 : i32
    %73 = arith.cmpi eq, %c128_i32_25, %c0_i32_26 : i32
    %c1_i32_27 = arith.constant 1 : i32
    %74 = arith.select %73, %c1_i32_27, %c128_i32_25 : i32
    %75 = vector.broadcast %74 : i32 to vector<8x256xi32>
    %76 = arith.remsi %72, %75 : vector<8x256xi32>
    %c0_i32_28 = arith.constant 0 : i32
    %77 = vector.broadcast %c0_i32_28 : i32 to vector<8x256xi32>
    %78 = arith.cmpi ne, %76, %77 : vector<8x256xi32>
    %c0_i32_29 = arith.constant 0 : i32
    %79 = vector.broadcast %c0_i32_29 : i32 to vector<8x256xi32>
    %80 = arith.cmpi slt, %76, %79 : vector<8x256xi32>
    %c0_i32_30 = arith.constant 0 : i32
    %81 = arith.cmpi slt, %74, %c0_i32_30 : i32
    %82 = vector.broadcast %81 : i1 to vector<8x256xi1>
    %83 = vector.broadcast %82 : vector<8x256xi1> to vector<8x256xi1>
    %84 = arith.xori %80, %83 : vector<8x256xi1>
    %85 = arith.andi %84, %78 : vector<8x256xi1>
    %86 = vector.broadcast %74 : i32 to vector<8x256xi32>
    %87 = arith.addi %76, %86 : vector<8x256xi32>
    %88 = arith.select %85, %87, %76 : vector<8x256xi1>, vector<8x256xi32>
    %c1_i32_31 = arith.constant 1 : i32
    %89 = vector.broadcast %c1_i32_31 : i32 to vector<8x256xi32>
    %90 = arith.cmpi sge, %88, %89 : vector<8x256xi32>
    %cst_32 = arith.constant 0.000000e+00 : f32
    %91 = vector.broadcast %cst_32 : f32 to vector<8x256xf32>
    %92 = arith.select %90, %71, %91 : vector<8x256xi1>, vector<8x256xf32>
    %93 = tpu.concatenate %26, %48, %70, %92, %4 in 0 : vector<8x256xf32>, vector<8x256xf32>, vector<8x256xf32>, vector<8x256xf32>, vector<8x256xf32> -> vector<40x256xf32>
    %c0_33 = arith.constant 0 : index
    %c0_34 = arith.constant 0 : index
    %94 = vector.load %arg1[%c0_33, %c0_34] : memref<16x40xf32, #tpu.memory_space<vmem>>, vector<16x40xf32>
    %cst_35 = arith.constant dense<0.000000e+00> : vector<16x256xf32>
    %95 = tpu.matmul %94, %93, %cst_35 {dimension_numbers = #tpu.dot_dimension_numbers<[1], [0], [0], [1], [0, 0, 1, 1], [], []>} : vector<16x40xf32>, vector<40x256xf32>, vector<16x256xf32> -> vector<16x256xf32>
    %c0_36 = arith.constant 0 : index
    %c0_37 = arith.constant 0 : index
    %96 = vector.load %arg2[%c0_36, %c0_37] : memref<16x1xf32, #tpu.memory_space<vmem>>, vector<16x1xf32>
    %97 = vector.broadcast %96 : vector<16x1xf32> to vector<16x256xf32>
    %98 = arith.addf %95, %97 : vector<16x256xf32>
    %cst_38 = arith.constant 0.000000e+00 : f32
    %99 = vector.broadcast %cst_38 : f32 to vector<16x256xf32>
    %100 = arith.maximumf %98, %99 : vector<16x256xf32>
    %c4_i32_39 = arith.constant 4 : i32
    %101 = tpu.dynamic_rotate %100 by %c4_i32_39 dim 1 : vector<16x256xf32>, i32 -> vector<16x256xf32>
    %102 = tpu.iota {dimensions = array<i32: 1>} : vector<16x256xi32>
    %c128_i32_40 = arith.constant 128 : i32
    %c0_i32_41 = arith.constant 0 : i32
    %103 = arith.cmpi eq, %c128_i32_40, %c0_i32_41 : i32
    %c1_i32_42 = arith.constant 1 : i32
    %104 = arith.select %103, %c1_i32_42, %c128_i32_40 : i32
    %105 = vector.broadcast %104 : i32 to vector<16x256xi32>
    %106 = arith.remsi %102, %105 : vector<16x256xi32>
    %c0_i32_43 = arith.constant 0 : i32
    %107 = vector.broadcast %c0_i32_43 : i32 to vector<16x256xi32>
    %108 = arith.cmpi ne, %106, %107 : vector<16x256xi32>
    %c0_i32_44 = arith.constant 0 : i32
    %109 = vector.broadcast %c0_i32_44 : i32 to vector<16x256xi32>
    %110 = arith.cmpi slt, %106, %109 : vector<16x256xi32>
    %c0_i32_45 = arith.constant 0 : i32
    %111 = arith.cmpi slt, %104, %c0_i32_45 : i32
    %112 = vector.broadcast %111 : i1 to vector<16x256xi1>
    %113 = vector.broadcast %112 : vector<16x256xi1> to vector<16x256xi1>
    %114 = arith.xori %110, %113 : vector<16x256xi1>
    %115 = arith.andi %114, %108 : vector<16x256xi1>
    %116 = vector.broadcast %104 : i32 to vector<16x256xi32>
    %117 = arith.addi %106, %116 : vector<16x256xi32>
    %118 = arith.select %115, %117, %106 : vector<16x256xi1>, vector<16x256xi32>
    %c4_i32_46 = arith.constant 4 : i32
    %119 = vector.broadcast %c4_i32_46 : i32 to vector<16x256xi32>
    %120 = arith.cmpi sge, %118, %119 : vector<16x256xi32>
    %cst_47 = arith.constant 0.000000e+00 : f32
    %121 = vector.broadcast %cst_47 : f32 to vector<16x256xf32>
    %122 = arith.select %120, %101, %121 : vector<16x256xi1>, vector<16x256xf32>
    %c3_i32_48 = arith.constant 3 : i32
    %123 = tpu.dynamic_rotate %100 by %c3_i32_48 dim 1 : vector<16x256xf32>, i32 -> vector<16x256xf32>
    %124 = tpu.iota {dimensions = array<i32: 1>} : vector<16x256xi32>
    %c128_i32_49 = arith.constant 128 : i32
    %c0_i32_50 = arith.constant 0 : i32
    %125 = arith.cmpi eq, %c128_i32_49, %c0_i32_50 : i32
    %c1_i32_51 = arith.constant 1 : i32
    %126 = arith.select %125, %c1_i32_51, %c128_i32_49 : i32
    %127 = vector.broadcast %126 : i32 to vector<16x256xi32>
    %128 = arith.remsi %124, %127 : vector<16x256xi32>
    %c0_i32_52 = arith.constant 0 : i32
    %129 = vector.broadcast %c0_i32_52 : i32 to vector<16x256xi32>
    %130 = arith.cmpi ne, %128, %129 : vector<16x256xi32>
    %c0_i32_53 = arith.constant 0 : i32
    %131 = vector.broadcast %c0_i32_53 : i32 to vector<16x256xi32>
    %132 = arith.cmpi slt, %128, %131 : vector<16x256xi32>
    %c0_i32_54 = arith.constant 0 : i32
    %133 = arith.cmpi slt, %126, %c0_i32_54 : i32
    %134 = vector.broadcast %133 : i1 to vector<16x256xi1>
    %135 = vector.broadcast %134 : vector<16x256xi1> to vector<16x256xi1>
    %136 = arith.xori %132, %135 : vector<16x256xi1>
    %137 = arith.andi %136, %130 : vector<16x256xi1>
    %138 = vector.broadcast %126 : i32 to vector<16x256xi32>
    %139 = arith.addi %128, %138 : vector<16x256xi32>
    %140 = arith.select %137, %139, %128 : vector<16x256xi1>, vector<16x256xi32>
    %c3_i32_55 = arith.constant 3 : i32
    %141 = vector.broadcast %c3_i32_55 : i32 to vector<16x256xi32>
    %142 = arith.cmpi sge, %140, %141 : vector<16x256xi32>
    %cst_56 = arith.constant 0.000000e+00 : f32
    %143 = vector.broadcast %cst_56 : f32 to vector<16x256xf32>
    %144 = arith.select %142, %123, %143 : vector<16x256xi1>, vector<16x256xf32>
    %c2_i32_57 = arith.constant 2 : i32
    %145 = tpu.dynamic_rotate %100 by %c2_i32_57 dim 1 : vector<16x256xf32>, i32 -> vector<16x256xf32>
    %146 = tpu.iota {dimensions = array<i32: 1>} : vector<16x256xi32>
    %c128_i32_58 = arith.constant 128 : i32
    %c0_i32_59 = arith.constant 0 : i32
    %147 = arith.cmpi eq, %c128_i32_58, %c0_i32_59 : i32
    %c1_i32_60 = arith.constant 1 : i32
    %148 = arith.select %147, %c1_i32_60, %c128_i32_58 : i32
    %149 = vector.broadcast %148 : i32 to vector<16x256xi32>
    %150 = arith.remsi %146, %149 : vector<16x256xi32>
    %c0_i32_61 = arith.constant 0 : i32
    %151 = vector.broadcast %c0_i32_61 : i32 to vector<16x256xi32>
    %152 = arith.cmpi ne, %150, %151 : vector<16x256xi32>
    %c0_i32_62 = arith.constant 0 : i32
    %153 = vector.broadcast %c0_i32_62 : i32 to vector<16x256xi32>
    %154 = arith.cmpi slt, %150, %153 : vector<16x256xi32>
    %c0_i32_63 = arith.constant 0 : i32
    %155 = arith.cmpi slt, %148, %c0_i32_63 : i32
    %156 = vector.broadcast %155 : i1 to vector<16x256xi1>
    %157 = vector.broadcast %156 : vector<16x256xi1> to vector<16x256xi1>
    %158 = arith.xori %154, %157 : vector<16x256xi1>
    %159 = arith.andi %158, %152 : vector<16x256xi1>
    %160 = vector.broadcast %148 : i32 to vector<16x256xi32>
    %161 = arith.addi %150, %160 : vector<16x256xi32>
    %162 = arith.select %159, %161, %150 : vector<16x256xi1>, vector<16x256xi32>
    %c2_i32_64 = arith.constant 2 : i32
    %163 = vector.broadcast %c2_i32_64 : i32 to vector<16x256xi32>
    %164 = arith.cmpi sge, %162, %163 : vector<16x256xi32>
    %cst_65 = arith.constant 0.000000e+00 : f32
    %165 = vector.broadcast %cst_65 : f32 to vector<16x256xf32>
    %166 = arith.select %164, %145, %165 : vector<16x256xi1>, vector<16x256xf32>
    %c1_i32_66 = arith.constant 1 : i32
    %167 = tpu.dynamic_rotate %100 by %c1_i32_66 dim 1 : vector<16x256xf32>, i32 -> vector<16x256xf32>
    %168 = tpu.iota {dimensions = array<i32: 1>} : vector<16x256xi32>
    %c128_i32_67 = arith.constant 128 : i32
    %c0_i32_68 = arith.constant 0 : i32
    %169 = arith.cmpi eq, %c128_i32_67, %c0_i32_68 : i32
    %c1_i32_69 = arith.constant 1 : i32
    %170 = arith.select %169, %c1_i32_69, %c128_i32_67 : i32
    %171 = vector.broadcast %170 : i32 to vector<16x256xi32>
    %172 = arith.remsi %168, %171 : vector<16x256xi32>
    %c0_i32_70 = arith.constant 0 : i32
    %173 = vector.broadcast %c0_i32_70 : i32 to vector<16x256xi32>
    %174 = arith.cmpi ne, %172, %173 : vector<16x256xi32>
    %c0_i32_71 = arith.constant 0 : i32
    %175 = vector.broadcast %c0_i32_71 : i32 to vector<16x256xi32>
    %176 = arith.cmpi slt, %172, %175 : vector<16x256xi32>
    %c0_i32_72 = arith.constant 0 : i32
    %177 = arith.cmpi slt, %170, %c0_i32_72 : i32
    %178 = vector.broadcast %177 : i1 to vector<16x256xi1>
    %179 = vector.broadcast %178 : vector<16x256xi1> to vector<16x256xi1>
    %180 = arith.xori %176, %179 : vector<16x256xi1>
    %181 = arith.andi %180, %174 : vector<16x256xi1>
    %182 = vector.broadcast %170 : i32 to vector<16x256xi32>
    %183 = arith.addi %172, %182 : vector<16x256xi32>
    %184 = arith.select %181, %183, %172 : vector<16x256xi1>, vector<16x256xi32>
    %c1_i32_73 = arith.constant 1 : i32
    %185 = vector.broadcast %c1_i32_73 : i32 to vector<16x256xi32>
    %186 = arith.cmpi sge, %184, %185 : vector<16x256xi32>
    %cst_74 = arith.constant 0.000000e+00 : f32
    %187 = vector.broadcast %cst_74 : f32 to vector<16x256xf32>
    %188 = arith.select %186, %167, %187 : vector<16x256xi1>, vector<16x256xf32>
    %189 = tpu.concatenate %122, %144, %166, %188, %100 in 0 : vector<16x256xf32>, vector<16x256xf32>, vector<16x256xf32>, vector<16x256xf32>, vector<16x256xf32> -> vector<80x256xf32>
    %c0_75 = arith.constant 0 : index
    %c0_76 = arith.constant 0 : index
    %190 = vector.load %arg3[%c0_75, %c0_76] : memref<16x80xf32, #tpu.memory_space<vmem>>, vector<16x80xf32>
    %cst_77 = arith.constant dense<0.000000e+00> : vector<16x256xf32>
    %191 = tpu.matmul %190, %189, %cst_77 {dimension_numbers = #tpu.dot_dimension_numbers<[1], [0], [0], [1], [0, 0, 1, 1], [], []>} : vector<16x80xf32>, vector<80x256xf32>, vector<16x256xf32> -> vector<16x256xf32>
    %c0_78 = arith.constant 0 : index
    %c0_79 = arith.constant 0 : index
    %192 = vector.load %arg4[%c0_78, %c0_79] : memref<16x1xf32, #tpu.memory_space<vmem>>, vector<16x1xf32>
    %193 = vector.broadcast %192 : vector<16x1xf32> to vector<16x256xf32>
    %194 = arith.addf %191, %193 : vector<16x256xf32>
    %cst_80 = arith.constant 0.000000e+00 : f32
    %195 = vector.broadcast %cst_80 : f32 to vector<16x256xf32>
    %196 = arith.maximumf %194, %195 : vector<16x256xf32>
    %c0_81 = arith.constant 0 : index
    %c0_82 = arith.constant 0 : index
    %197 = vector.load %arg5[%c0_81, %c0_82] : memref<16x8xf32, #tpu.memory_space<vmem>>, vector<16x8xf32>
    %cst_83 = arith.constant dense<0.000000e+00> : vector<16x256xf32>
    %198 = tpu.matmul %197, %4, %cst_83 {dimension_numbers = #tpu.dot_dimension_numbers<[1], [0], [0], [1], [0, 0, 1, 1], [], []>} : vector<16x8xf32>, vector<8x256xf32>, vector<16x256xf32> -> vector<16x256xf32>
    %c0_84 = arith.constant 0 : index
    %c0_85 = arith.constant 0 : index
    %199 = vector.load %arg6[%c0_84, %c0_85] : memref<16x1xf32, #tpu.memory_space<vmem>>, vector<16x1xf32>
    %200 = vector.broadcast %199 : vector<16x1xf32> to vector<16x256xf32>
    %201 = arith.addf %198, %200 : vector<16x256xf32>
    %202 = arith.addf %196, %201 : vector<16x256xf32>
    %cst_86 = arith.constant 0.000000e+00 : f32
    %203 = vector.broadcast %cst_86 : f32 to vector<16x256xf32>
    %204 = arith.maximumf %202, %203 : vector<16x256xf32>
    %c8_i32 = arith.constant 8 : i32
    %205 = tpu.dynamic_rotate %204 by %c8_i32 dim 1 : vector<16x256xf32>, i32 -> vector<16x256xf32>
    %206 = tpu.iota {dimensions = array<i32: 1>} : vector<16x256xi32>
    %c128_i32_87 = arith.constant 128 : i32
    %c0_i32_88 = arith.constant 0 : i32
    %207 = arith.cmpi eq, %c128_i32_87, %c0_i32_88 : i32
    %c1_i32_89 = arith.constant 1 : i32
    %208 = arith.select %207, %c1_i32_89, %c128_i32_87 : i32
    %209 = vector.broadcast %208 : i32 to vector<16x256xi32>
    %210 = arith.remsi %206, %209 : vector<16x256xi32>
    %c0_i32_90 = arith.constant 0 : i32
    %211 = vector.broadcast %c0_i32_90 : i32 to vector<16x256xi32>
    %212 = arith.cmpi ne, %210, %211 : vector<16x256xi32>
    %c0_i32_91 = arith.constant 0 : i32
    %213 = vector.broadcast %c0_i32_91 : i32 to vector<16x256xi32>
    %214 = arith.cmpi slt, %210, %213 : vector<16x256xi32>
    %c0_i32_92 = arith.constant 0 : i32
    %215 = arith.cmpi slt, %208, %c0_i32_92 : i32
    %216 = vector.broadcast %215 : i1 to vector<16x256xi1>
    %217 = vector.broadcast %216 : vector<16x256xi1> to vector<16x256xi1>
    %218 = arith.xori %214, %217 : vector<16x256xi1>
    %219 = arith.andi %218, %212 : vector<16x256xi1>
    %220 = vector.broadcast %208 : i32 to vector<16x256xi32>
    %221 = arith.addi %210, %220 : vector<16x256xi32>
    %222 = arith.select %219, %221, %210 : vector<16x256xi1>, vector<16x256xi32>
    %c8_i32_93 = arith.constant 8 : i32
    %223 = vector.broadcast %c8_i32_93 : i32 to vector<16x256xi32>
    %224 = arith.cmpi sge, %222, %223 : vector<16x256xi32>
    %cst_94 = arith.constant 0.000000e+00 : f32
    %225 = vector.broadcast %cst_94 : f32 to vector<16x256xf32>
    %226 = arith.select %224, %205, %225 : vector<16x256xi1>, vector<16x256xf32>
    %c6_i32 = arith.constant 6 : i32
    %227 = tpu.dynamic_rotate %204 by %c6_i32 dim 1 : vector<16x256xf32>, i32 -> vector<16x256xf32>
    %228 = tpu.iota {dimensions = array<i32: 1>} : vector<16x256xi32>
    %c128_i32_95 = arith.constant 128 : i32
    %c0_i32_96 = arith.constant 0 : i32
    %229 = arith.cmpi eq, %c128_i32_95, %c0_i32_96 : i32
    %c1_i32_97 = arith.constant 1 : i32
    %230 = arith.select %229, %c1_i32_97, %c128_i32_95 : i32
    %231 = vector.broadcast %230 : i32 to vector<16x256xi32>
    %232 = arith.remsi %228, %231 : vector<16x256xi32>
    %c0_i32_98 = arith.constant 0 : i32
    %233 = vector.broadcast %c0_i32_98 : i32 to vector<16x256xi32>
    %234 = arith.cmpi ne, %232, %233 : vector<16x256xi32>
    %c0_i32_99 = arith.constant 0 : i32
    %235 = vector.broadcast %c0_i32_99 : i32 to vector<16x256xi32>
    %236 = arith.cmpi slt, %232, %235 : vector<16x256xi32>
    %c0_i32_100 = arith.constant 0 : i32
    %237 = arith.cmpi slt, %230, %c0_i32_100 : i32
    %238 = vector.broadcast %237 : i1 to vector<16x256xi1>
    %239 = vector.broadcast %238 : vector<16x256xi1> to vector<16x256xi1>
    %240 = arith.xori %236, %239 : vector<16x256xi1>
    %241 = arith.andi %240, %234 : vector<16x256xi1>
    %242 = vector.broadcast %230 : i32 to vector<16x256xi32>
    %243 = arith.addi %232, %242 : vector<16x256xi32>
    %244 = arith.select %241, %243, %232 : vector<16x256xi1>, vector<16x256xi32>
    %c6_i32_101 = arith.constant 6 : i32
    %245 = vector.broadcast %c6_i32_101 : i32 to vector<16x256xi32>
    %246 = arith.cmpi sge, %244, %245 : vector<16x256xi32>
    %cst_102 = arith.constant 0.000000e+00 : f32
    %247 = vector.broadcast %cst_102 : f32 to vector<16x256xf32>
    %248 = arith.select %246, %227, %247 : vector<16x256xi1>, vector<16x256xf32>
    %c4_i32_103 = arith.constant 4 : i32
    %249 = tpu.dynamic_rotate %204 by %c4_i32_103 dim 1 : vector<16x256xf32>, i32 -> vector<16x256xf32>
    %250 = tpu.iota {dimensions = array<i32: 1>} : vector<16x256xi32>
    %c128_i32_104 = arith.constant 128 : i32
    %c0_i32_105 = arith.constant 0 : i32
    %251 = arith.cmpi eq, %c128_i32_104, %c0_i32_105 : i32
    %c1_i32_106 = arith.constant 1 : i32
    %252 = arith.select %251, %c1_i32_106, %c128_i32_104 : i32
    %253 = vector.broadcast %252 : i32 to vector<16x256xi32>
    %254 = arith.remsi %250, %253 : vector<16x256xi32>
    %c0_i32_107 = arith.constant 0 : i32
    %255 = vector.broadcast %c0_i32_107 : i32 to vector<16x256xi32>
    %256 = arith.cmpi ne, %254, %255 : vector<16x256xi32>
    %c0_i32_108 = arith.constant 0 : i32
    %257 = vector.broadcast %c0_i32_108 : i32 to vector<16x256xi32>
    %258 = arith.cmpi slt, %254, %257 : vector<16x256xi32>
    %c0_i32_109 = arith.constant 0 : i32
    %259 = arith.cmpi slt, %252, %c0_i32_109 : i32
    %260 = vector.broadcast %259 : i1 to vector<16x256xi1>
    %261 = vector.broadcast %260 : vector<16x256xi1> to vector<16x256xi1>
    %262 = arith.xori %258, %261 : vector<16x256xi1>
    %263 = arith.andi %262, %256 : vector<16x256xi1>
    %264 = vector.broadcast %252 : i32 to vector<16x256xi32>
    %265 = arith.addi %254, %264 : vector<16x256xi32>
    %266 = arith.select %263, %265, %254 : vector<16x256xi1>, vector<16x256xi32>
    %c4_i32_110 = arith.constant 4 : i32
    %267 = vector.broadcast %c4_i32_110 : i32 to vector<16x256xi32>
    %268 = arith.cmpi sge, %266, %267 : vector<16x256xi32>
    %cst_111 = arith.constant 0.000000e+00 : f32
    %269 = vector.broadcast %cst_111 : f32 to vector<16x256xf32>
    %270 = arith.select %268, %249, %269 : vector<16x256xi1>, vector<16x256xf32>
    %c2_i32_112 = arith.constant 2 : i32
    %271 = tpu.dynamic_rotate %204 by %c2_i32_112 dim 1 : vector<16x256xf32>, i32 -> vector<16x256xf32>
    %272 = tpu.iota {dimensions = array<i32: 1>} : vector<16x256xi32>
    %c128_i32_113 = arith.constant 128 : i32
    %c0_i32_114 = arith.constant 0 : i32
    %273 = arith.cmpi eq, %c128_i32_113, %c0_i32_114 : i32
    %c1_i32_115 = arith.constant 1 : i32
    %274 = arith.select %273, %c1_i32_115, %c128_i32_113 : i32
    %275 = vector.broadcast %274 : i32 to vector<16x256xi32>
    %276 = arith.remsi %272, %275 : vector<16x256xi32>
    %c0_i32_116 = arith.constant 0 : i32
    %277 = vector.broadcast %c0_i32_116 : i32 to vector<16x256xi32>
    %278 = arith.cmpi ne, %276, %277 : vector<16x256xi32>
    %c0_i32_117 = arith.constant 0 : i32
    %279 = vector.broadcast %c0_i32_117 : i32 to vector<16x256xi32>
    %280 = arith.cmpi slt, %276, %279 : vector<16x256xi32>
    %c0_i32_118 = arith.constant 0 : i32
    %281 = arith.cmpi slt, %274, %c0_i32_118 : i32
    %282 = vector.broadcast %281 : i1 to vector<16x256xi1>
    %283 = vector.broadcast %282 : vector<16x256xi1> to vector<16x256xi1>
    %284 = arith.xori %280, %283 : vector<16x256xi1>
    %285 = arith.andi %284, %278 : vector<16x256xi1>
    %286 = vector.broadcast %274 : i32 to vector<16x256xi32>
    %287 = arith.addi %276, %286 : vector<16x256xi32>
    %288 = arith.select %285, %287, %276 : vector<16x256xi1>, vector<16x256xi32>
    %c2_i32_119 = arith.constant 2 : i32
    %289 = vector.broadcast %c2_i32_119 : i32 to vector<16x256xi32>
    %290 = arith.cmpi sge, %288, %289 : vector<16x256xi32>
    %cst_120 = arith.constant 0.000000e+00 : f32
    %291 = vector.broadcast %cst_120 : f32 to vector<16x256xf32>
    %292 = arith.select %290, %271, %291 : vector<16x256xi1>, vector<16x256xf32>
    %293 = tpu.concatenate %226, %248, %270, %292, %204 in 0 : vector<16x256xf32>, vector<16x256xf32>, vector<16x256xf32>, vector<16x256xf32>, vector<16x256xf32> -> vector<80x256xf32>
    %c0_121 = arith.constant 0 : index
    %c0_122 = arith.constant 0 : index
    %294 = vector.load %arg7[%c0_121, %c0_122] : memref<16x80xf32, #tpu.memory_space<vmem>>, vector<16x80xf32>
    %cst_123 = arith.constant dense<0.000000e+00> : vector<16x256xf32>
    %295 = tpu.matmul %294, %293, %cst_123 {dimension_numbers = #tpu.dot_dimension_numbers<[1], [0], [0], [1], [0, 0, 1, 1], [], []>} : vector<16x80xf32>, vector<80x256xf32>, vector<16x256xf32> -> vector<16x256xf32>
    %c0_124 = arith.constant 0 : index
    %c0_125 = arith.constant 0 : index
    %296 = vector.load %arg8[%c0_124, %c0_125] : memref<16x1xf32, #tpu.memory_space<vmem>>, vector<16x1xf32>
    %297 = vector.broadcast %296 : vector<16x1xf32> to vector<16x256xf32>
    %298 = arith.addf %295, %297 : vector<16x256xf32>
    %cst_126 = arith.constant 0.000000e+00 : f32
    %299 = vector.broadcast %cst_126 : f32 to vector<16x256xf32>
    %300 = arith.maximumf %298, %299 : vector<16x256xf32>
    %c8_i32_127 = arith.constant 8 : i32
    %301 = tpu.dynamic_rotate %300 by %c8_i32_127 dim 1 : vector<16x256xf32>, i32 -> vector<16x256xf32>
    %302 = tpu.iota {dimensions = array<i32: 1>} : vector<16x256xi32>
    %c128_i32_128 = arith.constant 128 : i32
    %c0_i32_129 = arith.constant 0 : i32
    %303 = arith.cmpi eq, %c128_i32_128, %c0_i32_129 : i32
    %c1_i32_130 = arith.constant 1 : i32
    %304 = arith.select %303, %c1_i32_130, %c128_i32_128 : i32
    %305 = vector.broadcast %304 : i32 to vector<16x256xi32>
    %306 = arith.remsi %302, %305 : vector<16x256xi32>
    %c0_i32_131 = arith.constant 0 : i32
    %307 = vector.broadcast %c0_i32_131 : i32 to vector<16x256xi32>
    %308 = arith.cmpi ne, %306, %307 : vector<16x256xi32>
    %c0_i32_132 = arith.constant 0 : i32
    %309 = vector.broadcast %c0_i32_132 : i32 to vector<16x256xi32>
    %310 = arith.cmpi slt, %306, %309 : vector<16x256xi32>
    %c0_i32_133 = arith.constant 0 : i32
    %311 = arith.cmpi slt, %304, %c0_i32_133 : i32
    %312 = vector.broadcast %311 : i1 to vector<16x256xi1>
    %313 = vector.broadcast %312 : vector<16x256xi1> to vector<16x256xi1>
    %314 = arith.xori %310, %313 : vector<16x256xi1>
    %315 = arith.andi %314, %308 : vector<16x256xi1>
    %316 = vector.broadcast %304 : i32 to vector<16x256xi32>
    %317 = arith.addi %306, %316 : vector<16x256xi32>
    %318 = arith.select %315, %317, %306 : vector<16x256xi1>, vector<16x256xi32>
    %c8_i32_134 = arith.constant 8 : i32
    %319 = vector.broadcast %c8_i32_134 : i32 to vector<16x256xi32>
    %320 = arith.cmpi sge, %318, %319 : vector<16x256xi32>
    %cst_135 = arith.constant 0.000000e+00 : f32
    %321 = vector.broadcast %cst_135 : f32 to vector<16x256xf32>
    %322 = arith.select %320, %301, %321 : vector<16x256xi1>, vector<16x256xf32>
    %c6_i32_136 = arith.constant 6 : i32
    %323 = tpu.dynamic_rotate %300 by %c6_i32_136 dim 1 : vector<16x256xf32>, i32 -> vector<16x256xf32>
    %324 = tpu.iota {dimensions = array<i32: 1>} : vector<16x256xi32>
    %c128_i32_137 = arith.constant 128 : i32
    %c0_i32_138 = arith.constant 0 : i32
    %325 = arith.cmpi eq, %c128_i32_137, %c0_i32_138 : i32
    %c1_i32_139 = arith.constant 1 : i32
    %326 = arith.select %325, %c1_i32_139, %c128_i32_137 : i32
    %327 = vector.broadcast %326 : i32 to vector<16x256xi32>
    %328 = arith.remsi %324, %327 : vector<16x256xi32>
    %c0_i32_140 = arith.constant 0 : i32
    %329 = vector.broadcast %c0_i32_140 : i32 to vector<16x256xi32>
    %330 = arith.cmpi ne, %328, %329 : vector<16x256xi32>
    %c0_i32_141 = arith.constant 0 : i32
    %331 = vector.broadcast %c0_i32_141 : i32 to vector<16x256xi32>
    %332 = arith.cmpi slt, %328, %331 : vector<16x256xi32>
    %c0_i32_142 = arith.constant 0 : i32
    %333 = arith.cmpi slt, %326, %c0_i32_142 : i32
    %334 = vector.broadcast %333 : i1 to vector<16x256xi1>
    %335 = vector.broadcast %334 : vector<16x256xi1> to vector<16x256xi1>
    %336 = arith.xori %332, %335 : vector<16x256xi1>
    %337 = arith.andi %336, %330 : vector<16x256xi1>
    %338 = vector.broadcast %326 : i32 to vector<16x256xi32>
    %339 = arith.addi %328, %338 : vector<16x256xi32>
    %340 = arith.select %337, %339, %328 : vector<16x256xi1>, vector<16x256xi32>
    %c6_i32_143 = arith.constant 6 : i32
    %341 = vector.broadcast %c6_i32_143 : i32 to vector<16x256xi32>
    %342 = arith.cmpi sge, %340, %341 : vector<16x256xi32>
    %cst_144 = arith.constant 0.000000e+00 : f32
    %343 = vector.broadcast %cst_144 : f32 to vector<16x256xf32>
    %344 = arith.select %342, %323, %343 : vector<16x256xi1>, vector<16x256xf32>
    %c4_i32_145 = arith.constant 4 : i32
    %345 = tpu.dynamic_rotate %300 by %c4_i32_145 dim 1 : vector<16x256xf32>, i32 -> vector<16x256xf32>
    %346 = tpu.iota {dimensions = array<i32: 1>} : vector<16x256xi32>
    %c128_i32_146 = arith.constant 128 : i32
    %c0_i32_147 = arith.constant 0 : i32
    %347 = arith.cmpi eq, %c128_i32_146, %c0_i32_147 : i32
    %c1_i32_148 = arith.constant 1 : i32
    %348 = arith.select %347, %c1_i32_148, %c128_i32_146 : i32
    %349 = vector.broadcast %348 : i32 to vector<16x256xi32>
    %350 = arith.remsi %346, %349 : vector<16x256xi32>
    %c0_i32_149 = arith.constant 0 : i32
    %351 = vector.broadcast %c0_i32_149 : i32 to vector<16x256xi32>
    %352 = arith.cmpi ne, %350, %351 : vector<16x256xi32>
    %c0_i32_150 = arith.constant 0 : i32
    %353 = vector.broadcast %c0_i32_150 : i32 to vector<16x256xi32>
    %354 = arith.cmpi slt, %350, %353 : vector<16x256xi32>
    %c0_i32_151 = arith.constant 0 : i32
    %355 = arith.cmpi slt, %348, %c0_i32_151 : i32
    %356 = vector.broadcast %355 : i1 to vector<16x256xi1>
    %357 = vector.broadcast %356 : vector<16x256xi1> to vector<16x256xi1>
    %358 = arith.xori %354, %357 : vector<16x256xi1>
    %359 = arith.andi %358, %352 : vector<16x256xi1>
    %360 = vector.broadcast %348 : i32 to vector<16x256xi32>
    %361 = arith.addi %350, %360 : vector<16x256xi32>
    %362 = arith.select %359, %361, %350 : vector<16x256xi1>, vector<16x256xi32>
    %c4_i32_152 = arith.constant 4 : i32
    %363 = vector.broadcast %c4_i32_152 : i32 to vector<16x256xi32>
    %364 = arith.cmpi sge, %362, %363 : vector<16x256xi32>
    %cst_153 = arith.constant 0.000000e+00 : f32
    %365 = vector.broadcast %cst_153 : f32 to vector<16x256xf32>
    %366 = arith.select %364, %345, %365 : vector<16x256xi1>, vector<16x256xf32>
    %c2_i32_154 = arith.constant 2 : i32
    %367 = tpu.dynamic_rotate %300 by %c2_i32_154 dim 1 : vector<16x256xf32>, i32 -> vector<16x256xf32>
    %368 = tpu.iota {dimensions = array<i32: 1>} : vector<16x256xi32>
    %c128_i32_155 = arith.constant 128 : i32
    %c0_i32_156 = arith.constant 0 : i32
    %369 = arith.cmpi eq, %c128_i32_155, %c0_i32_156 : i32
    %c1_i32_157 = arith.constant 1 : i32
    %370 = arith.select %369, %c1_i32_157, %c128_i32_155 : i32
    %371 = vector.broadcast %370 : i32 to vector<16x256xi32>
    %372 = arith.remsi %368, %371 : vector<16x256xi32>
    %c0_i32_158 = arith.constant 0 : i32
    %373 = vector.broadcast %c0_i32_158 : i32 to vector<16x256xi32>
    %374 = arith.cmpi ne, %372, %373 : vector<16x256xi32>
    %c0_i32_159 = arith.constant 0 : i32
    %375 = vector.broadcast %c0_i32_159 : i32 to vector<16x256xi32>
    %376 = arith.cmpi slt, %372, %375 : vector<16x256xi32>
    %c0_i32_160 = arith.constant 0 : i32
    %377 = arith.cmpi slt, %370, %c0_i32_160 : i32
    %378 = vector.broadcast %377 : i1 to vector<16x256xi1>
    %379 = vector.broadcast %378 : vector<16x256xi1> to vector<16x256xi1>
    %380 = arith.xori %376, %379 : vector<16x256xi1>
    %381 = arith.andi %380, %374 : vector<16x256xi1>
    %382 = vector.broadcast %370 : i32 to vector<16x256xi32>
    %383 = arith.addi %372, %382 : vector<16x256xi32>
    %384 = arith.select %381, %383, %372 : vector<16x256xi1>, vector<16x256xi32>
    %c2_i32_161 = arith.constant 2 : i32
    %385 = vector.broadcast %c2_i32_161 : i32 to vector<16x256xi32>
    %386 = arith.cmpi sge, %384, %385 : vector<16x256xi32>
    %cst_162 = arith.constant 0.000000e+00 : f32
    %387 = vector.broadcast %cst_162 : f32 to vector<16x256xf32>
    %388 = arith.select %386, %367, %387 : vector<16x256xi1>, vector<16x256xf32>
    %389 = tpu.concatenate %322, %344, %366, %388, %300 in 0 : vector<16x256xf32>, vector<16x256xf32>, vector<16x256xf32>, vector<16x256xf32>, vector<16x256xf32> -> vector<80x256xf32>
    %c0_163 = arith.constant 0 : index
    %c0_164 = arith.constant 0 : index
    %390 = vector.load %arg9[%c0_163, %c0_164] : memref<16x80xf32, #tpu.memory_space<vmem>>, vector<16x80xf32>
    %cst_165 = arith.constant dense<0.000000e+00> : vector<16x256xf32>
    %391 = tpu.matmul %390, %389, %cst_165 {dimension_numbers = #tpu.dot_dimension_numbers<[1], [0], [0], [1], [0, 0, 1, 1], [], []>} : vector<16x80xf32>, vector<80x256xf32>, vector<16x256xf32> -> vector<16x256xf32>
    %c0_166 = arith.constant 0 : index
    %c0_167 = arith.constant 0 : index
    %392 = vector.load %arg10[%c0_166, %c0_167] : memref<16x1xf32, #tpu.memory_space<vmem>>, vector<16x1xf32>
    %393 = vector.broadcast %392 : vector<16x1xf32> to vector<16x256xf32>
    %394 = arith.addf %391, %393 : vector<16x256xf32>
    %cst_168 = arith.constant 0.000000e+00 : f32
    %395 = vector.broadcast %cst_168 : f32 to vector<16x256xf32>
    %396 = arith.maximumf %394, %395 : vector<16x256xf32>
    %397 = arith.addf %396, %204 : vector<16x256xf32>
    %cst_169 = arith.constant 0.000000e+00 : f32
    %398 = vector.broadcast %cst_169 : f32 to vector<16x256xf32>
    %399 = arith.maximumf %397, %398 : vector<16x256xf32>
    %400 = vector.extract_strided_slice %399 {offsets = [0, 0], sizes = [16, 128], strides = [1, 1]} : vector<16x256xf32> to vector<16x128xf32>
    %c0_170 = arith.constant 0 : index
    %c0_171 = arith.constant 0 : index
    %c0_172 = arith.constant 0 : index
    %401 = vector.load %arg11[%c0_170, %c0_171, %c0_172] : memref<2x16x128xf32, #tpu.memory_space<vmem>>, vector<1x16x128xf32>
    %402 = vector.shape_cast %401 : vector<1x16x128xf32> to vector<16x128xf32>
    %403 = vector.shape_cast %400 : vector<16x128xf32> to vector<1x16x128xf32>
    tpu.vector_store %arg11[%c0_170, %c0_171, %c0_172], %403 {strides = array<i32>} : memref<2x16x128xf32, #tpu.memory_space<vmem>>, vector<1x16x128xf32>,
    %404 = vector.extract_strided_slice %399 {offsets = [0, 128], sizes = [16, 128], strides = [1, 1]} : vector<16x256xf32> to vector<16x128xf32>
    %c1_173 = arith.constant 1 : index
    %c0_174 = arith.constant 0 : index
    %c0_175 = arith.constant 0 : index
    %405 = vector.load %arg11[%c1_173, %c0_174, %c0_175] : memref<2x16x128xf32, #tpu.memory_space<vmem>>, vector<1x16x128xf32>
    %406 = vector.shape_cast %405 : vector<1x16x128xf32> to vector<16x128xf32>
    %407 = vector.shape_cast %404 : vector<16x128xf32> to vector<1x16x128xf32>
    tpu.vector_store %arg11[%c1_173, %c0_174, %c0_175], %407 {strides = array<i32>} : memref<2x16x128xf32, #tpu.memory_space<vmem>>, vector<1x16x128xf32>,
    return
  }
}

</mosaic_0001>

<bundles_post_ra>
// kernel: tpu_custom_call.1
= control target key start
LH: loop header
LB: loop body
LE: loop exit
PB: predicated region body
PF: predicated region fallthrough
CT: control target
= control target key end

     0   :  { %s1460_s0 = inlined_call_operand.vmem [shape: f32[2,8,128], index: 0, kind: input, shape index: {}]   ;;  %s1461_s1 = inlined_call_operand.vmem [shape: f32[16,40], index: 1, kind: input, shape index: {}]   ;;  %s1462_s2 = inlined_call_operand.vmem [shape: f32[16,1], index: 2, kind: input, shape index: {}]   ;;  %s1463_s3 = inlined_call_operand.vmem [shape: f32[16,80], index: 3, kind: input, shape index: {}]   ;;  %s1464_s4 = inlined_call_operand.vmem [shape: f32[16,1], index: 4, kind: input, shape index: {}]   ;;  %s1465_s5 = inlined_call_operand.vmem [shape: f32[16,8], index: 5, kind: input, shape index: {}]   ;;  %s1466_s6 = inlined_call_operand.vmem [shape: f32[16,1], index: 6, kind: input, shape index: {}]   ;;  %s1467_s7 = inlined_call_operand.vmem [shape: f32[16,80], index: 7, kind: input, shape index: {}]   ;;  %s1468_s8 = inlined_call_operand.vmem [shape: f32[16,1], index: 8, kind: input, shape index: {}]   ;;  %s1469_s9 = inlined_call_operand.vmem [shape: f32[16,80], index: 9, kind: input, shape index: {}]   ;;  %s1470_s10 = inlined_call_operand.vmem [shape: f32[16,1], index: 10, kind: input, shape index: {}]   ;;  %s1471_s11 = inlined_call_operand.hbm [shape: f32[2,16,128], index: 11, kind: output, shape index: {}]  }
   0x1   :  { %v1026_v0 = vld [vmem:[%s1460_s0] sm:$0xff] }
   0x2   :  { %16 = vsyncpa [#allocation3], 0  ;;  %s953_s19 = smov 2   ;;  %s954_s20 = smov 1   ;;  %v1035_v1 = vld [vmem:[%s1460_s0 + $0x8] sm:$0xff]  ;;  %v955_v2 = vmov 0.0   ;;  %v46_v6 = vlaneseq }
   0x3   :  { %91 = vrot.lane.b32.xlu1 %v1026_v0, %s953_s19  ;;  %102 = vrot.lane.b32.xlu0 %v1026_v0, %s954_s20  ;;  %v956_v3 = vmov 0   ;;  %s957_s0 = smov 3   ;;  %s958_s23 = smov 4   ;;  %v115_v4 = vld [vmem:[%s1462_s2] sm:$0xff]  ;;  %v116_v5 = vld [vmem:[%s1462_s2 + $0x8] sm:$0xff]  ;;  %vm127_vm12 = vcmask 326656  }
   0x4   :  { %156 = vmatprep.subr.mxu0 %v1035_v1  ;;  %198 = vmatprep.mubr.f32.mxu0 %v955_v2  ;;  %v1059_v7 = vand.u32 127, %v46_v6  ;;  %v113_v26 = vld [vmem:[%s1461_s1] sm:$0xff]  ;;  %v114_v27 = vld [vmem:[%s1461_s1 + $0x8] sm:$0xff]  ;;  %vm395_vm13 = vcmask 64512   ;;  %vm293_vm14 = vcmask 654336   ;;  %s960_s25 = smov 8  }
   0x5   :  { %157 = vmatpush1.msra.mxu0 %v1026_v0  ;;  %364 = vmatprep.mubr.f32.mxu1 %v955_v2  ;;  %v381_v28 = vld [vmem:[%s1465_s5] sm:$0xff]  ;;  %v382_v29 = vld [vmem:[%s1465_s5 + $0x8] sm:$0xff] }
   0x6   :  { %930 = vset.pattern.permute.xlu1 %v956_v3  ;;  %929 = vset.pattern.permute.xlu0 %v956_v3  ;;  %v51_v8 = vadd.s32 128, %v1059_v7  ;;  %vm106_vm0 = vcmp.lt.s32.totalorder %v1059_v7, 1  ;;  %vm95_vm2 = vcmp.lt.s32.totalorder %v1059_v7, 2  ;;  %vm109_vm3 = vcmp.ge.s32.totalorder %v1059_v7, 1  ;;  %v282_v44 = vld [vmem:[%s1464_s4 + $0x8] sm:$0xff]  ;;  %v281_v45 = vld [vmem:[%s1464_s4] sm:$0xff] }
   0x7   :  { %93 = vrot.lane.b32.xlu1 %v1035_v1, %s953_s19  ;;  %104 = vrot.lane.b32.xlu0 %v1035_v1, %s954_s20  ;;  %vm84_vm5 = vcmp.lt.s32.totalorder %v1059_v7, 3  ;;  %vm98_vm6 = vcmp.ge.s32.totalorder %v1059_v7, 2  ;;  %vm87_vm8 = vcmp.ge.s32.totalorder %v1059_v7, 3  ;;  %vm48_vm9 = vcmp.lt.s32.totalorder %v1059_v7, 4  ;;  %v384_v46 = vld [vmem:[%s1466_s6 + $0x8] sm:$0xff]  ;;  %v383_v47 = vld [vmem:[%s1466_s6] sm:$0xff] }
   0x8   :  { %v1062_v9 = vand.u32 127, %v51_v8  ;;  %vm76_vm11 = vcmp.ge.s32.totalorder %v1059_v7, 4 }
   0xa   :  { %vm110_vm1 = vcmp.ge.s32.totalorder %v1062_v9, 1  ;;  %vm99_vm4 = vcmp.ge.s32.totalorder %v1062_v9, 2  ;;  %vm88_vm7 = vcmp.ge.s32.totalorder %v1062_v9, 3  ;;  %vm77_vm10 = vcmp.ge.s32.totalorder %v1062_v9, 4 }
   0xb   :  { %82 = vrot.lane.b32.xlu1 %v1035_v1, %s957_s0  ;;  %80 = vrot.lane.b32.xlu0 %v1026_v0, %s957_s0  ;;  %vm520_vm15 = vcmp.ge.s32.totalorder %v1062_v9, 6 }
   0xf   :  { %44 = vrot.lane.b32.xlu1 %v1035_v1, %s958_s23  ;;  %42 = vrot.lane.b32.xlu0 %v1026_v0, %s958_s23 }
  0x13   :  { %119 = vperm.xlu1 %930, %v115_v4   ;;  %124 = vperm.xlu0 %929, %v116_v5  }
  0x75   :  { %v92_v10 = vpop.permute.xlu1 %91  ;;  %v103_v11 = vpop.permute.xlu0 %102 }
  0x79   :  { %v94_v12 = vpop.permute.xlu1 %93  ;;  %v105_v13 = vpop.permute.xlu0 %104 }
  0x7a   :  { %v107_v14 = vsel %vm106_vm0, %v103_v11, %v105_v13  ;;  %v108_v15 = vsel %vm106_vm0, %v105_v13, %v103_v11  ;;  %v96_v16 = vsel %vm95_vm2, %v92_v10, %v94_v12  ;;  %v97_v17 = vsel %vm95_vm2, %v94_v12, %v92_v10 }
  0x7b   :  { %853 = vmatprep.subr.msk.mxu0 %vm110_vm1, %v107_v14 }
  0x7c   :  { %854 = vmatpush1.msk.msra.mxu0 %vm109_vm3, %v108_v15 }
  0x7d   :  { %v83_v18 = vpop.permute.xlu1 %82  ;;  %v81_v19 = vpop.permute.xlu0 %80  ;;  %855 = vmatprep.subr.msk.mxu0 %vm99_vm4, %v96_v16 }
  0x7e   :  { %v85_v20 = vsel %vm84_vm5, %v81_v19, %v83_v18  ;;  %v86_v21 = vsel %vm84_vm5, %v83_v18, %v81_v19  ;;  %856 = vmatpush1.msk.msra.mxu0 %vm98_vm6, %v97_v17  ;;  %v279_v19 = vld [vmem:[%s1463_s3] sm:$0xff] }
  0x7f   :  { %857 = vmatprep.subr.msk.mxu0 %vm88_vm7, %v85_v20  ;;  %v280_v20 = vld [vmem:[%s1463_s3 + $0x8] sm:$0xff]  ;;  %s959_s3 = smov 6  }
  0x80   :  { %858 = vmatpush1.msk.msra.mxu0 %vm87_vm8, %v86_v21 }
  0x81   :  { %v45_v22 = vpop.permute.xlu1 %44  ;;  %v43_v23 = vpop.permute.xlu0 %42 }
  0x82   :  { %v49_v24 = vsel %vm48_vm9, %v43_v23, %v45_v22  ;;  %v50_v25 = vsel %vm48_vm9, %v45_v22, %v43_v23 }
  0x83   :  { %859 = vmatprep.subr.msk.mxu0 %vm77_vm10, %v49_v24 }
  0x84   :  { %860 = vmatpush1.msk.msra.mxu0 %vm76_vm11, %v50_v25 }
  0x85   :  { %861 = vmatmul.mubr.msk.f32.vlgmr.msra.gmra.mxu0 %vm127_vm12, %v113_v26  ;;  %432 = vmatprep.subr.mxu0 %v1035_v1 }
  0x86   :  { %204 = vmatprep.mubr.f32.mxu0 %v955_v2  ;;  %433 = vmatpush1.msra.mxu0 %v1026_v0 }
  0x89   :  { %862 = vmatmul.mubr.msk.f32.gmra.mxu0 %vm127_vm12, %v114_v27 }
  0x8a   :  { %466 = vmatprep.mubr.f32.mxu0 %v955_v2 }
  0x8d   :  { %881 = vmatmul.mubr.msk.f32.vlgmr.msra.gmra.mxu0 %vm395_vm13, %v381_v28 }
  0x8e   :  { %472 = vmatprep.mubr.f32.mxu0 %v955_v2  ;;  %v120_v30 = vpop.permute.xlu1 %119  ;;  %v125_v34 = vpop.permute.xlu0 %124 }
  0x91   :  { %882 = vmatmul.mubr.msk.f32.gmra.mxu0 %vm395_vm13, %v382_v29 }
  0x92   :  { %641 = vmatprep.mubr.f32.mxu0 %v955_v2 }
 0x145   :  { %v200_v31 = vpop.f32.mrf.mxu0 }
 0x146   :  { %v201_v32 = vadd.f32 %v200_v31, %v120_v30 }
 0x147   :  { %v202_v33 = vpop.f32.mrf.mxu0 }
 0x148   :  { %v211_v35 = vmax.f32 %v201_v32, 0.0  ;;  %v203_v36 = vadd.f32 %v202_v33, %v120_v30 }
 0x149   :  { %v206_v37 = vpop.f32.mrf.mxu0 }
 0x14a   :  { %v212_v38 = vmax.f32 %v203_v36, 0.0  ;;  %263 = vrot.lane.b32.xlu1 %v211_v35, %s954_s20  ;;  %v207_v39 = vadd.f32 %v206_v37, %v125_v34 }
 0x14b   :  { %v208_v40 = vpop.f32.mrf.mxu0 }
 0x14c   :  { %v209_v41 = vadd.f32 %v208_v40, %v125_v34  ;;  %267 = vrot.lane.b32.xlu0 %v212_v38, %s954_s20  ;;  %v213_v42 = vmax.f32 %v207_v39, 0.0 }
 0x14d   :  { %v468_v21 = vpop.f32.mrf.mxu0 }
 0x14e   :  { %v214_v43 = vmax.f32 %v209_v41, 0.0  ;;  %247 = vrot.lane.b32.xlu1 %v211_v35, %s953_s19 }
 0x14f   :  { %v470_v23 = vpop.f32.mrf.mxu0 }
 0x150   :  { %312 = vmatprep.subr.mxu1 %v214_v43  ;;  %251 = vrot.lane.b32.xlu0 %v212_v38, %s953_s19 }
 0x151   :  { %313 = vmatpush1.msra.mxu1 %v213_v42  ;;  %v474_v28 = vpop.f32.mrf.mxu0 }
 0x152   :  { %314 = vmatprep.subr.mxu1 %v212_v38  ;;  %231 = vrot.lane.b32.xlu1 %v211_v35, %s957_s0 }
 0x153   :  { %315 = vmatpush1.msra.mxu1 %v211_v35  ;;  %v476_v39 = vpop.f32.mrf.mxu0 }
 0x154   :  { %235 = vrot.lane.b32.xlu0 %v212_v38, %s957_s0 }
 0x156   :  { %265 = vrot.lane.b32.xlu1 %v213_v42, %s954_s20 }
 0x158   :  { %269 = vrot.lane.b32.xlu0 %v214_v43, %s954_s20 }
 0x15a   :  { %249 = vrot.lane.b32.xlu1 %v213_v42, %s953_s19 }
 0x15c   :  { %253 = vrot.lane.b32.xlu0 %v214_v43, %s953_s19 }
 0x15e   :  { %233 = vrot.lane.b32.xlu1 %v213_v42, %s957_s0 }
 0x160   :  { %237 = vrot.lane.b32.xlu0 %v214_v43, %s957_s0 }
 0x162   :  { %217 = vrot.lane.b32.xlu1 %v213_v42, %s958_s23 }
 0x164   :  { %221 = vrot.lane.b32.xlu0 %v214_v43, %s958_s23 }
 0x166   :  { %215 = vrot.lane.b32.xlu1 %v211_v35, %s958_s23 }
 0x168   :  { %219 = vrot.lane.b32.xlu0 %v212_v38, %s958_s23 }
 0x16a   :  { %290 = vperm.xlu1 %930, %v282_v44  }
 0x16c   :  { %285 = vperm.xlu0 %929, %v281_v45  }
 0x16e   :  { %392 = vperm.xlu1 %930, %v384_v46  }
 0x170   :  { %387 = vperm.xlu0 %929, %v383_v47  }
 0x1bc   :  { %v264_v48 = vpop.permute.xlu1 %263 }
 0x1be   :  { %v268_v49 = vpop.permute.xlu0 %267 }
 0x1bf   :  { %v271_v59 = vsel %vm106_vm0, %v264_v48, %v268_v49  ;;  %v273_v60 = vsel %vm106_vm0, %v268_v49, %v264_v48 }
 0x1c0   :  { %v248_v50 = vpop.permute.xlu1 %247 }
 0x1c2   :  { %v252_v51 = vpop.permute.xlu0 %251 }
 0x1c3   :  { %v255_v1 = vsel %vm95_vm2, %v248_v50, %v252_v51  ;;  %v257_v3 = vsel %vm95_vm2, %v252_v51, %v248_v50 }
 0x1c4   :  { %v232_v52 = vpop.permute.xlu1 %231 }
 0x1c6   :  { %v236_v53 = vpop.permute.xlu0 %235 }
 0x1c7   :  { %v239_v10 = vsel %vm84_vm5, %v232_v52, %v236_v53  ;;  %v241_v11 = vsel %vm84_vm5, %v236_v53, %v232_v52  ;;  %v560_v53 = vld [vmem:[%s1468_s8 + $0x8] sm:$0xff] }
 0x1c8   :  { %v266_v54 = vpop.permute.xlu1 %265 }
 0x1ca   :  { %v270_v55 = vpop.permute.xlu0 %269 }
 0x1cb   :  { %v272_v56 = vsel %vm106_vm0, %v266_v54, %v270_v55  ;;  %v274_v57 = vsel %vm106_vm0, %v270_v55, %v266_v54  ;;  %v559_v54 = vld [vmem:[%s1468_s8] sm:$0xff]  ;;  %vm514_vm0 = vcmp.lt.s32.totalorder %v1059_v7, 6 }
 0x1cc   :  { %v250_v58 = vpop.permute.xlu1 %249  ;;  %863 = vmatprep.subr.msk.mxu1 %vm110_vm1, %v272_v56 }
 0x1cd   :  { %864 = vmatpush1.msk.msra.mxu1 %vm109_vm3, %v274_v57 }
 0x1ce   :  { %v254_v61 = vpop.permute.xlu0 %253  ;;  %865 = vmatprep.subr.msk.mxu1 %vm110_vm1, %v271_v59  ;;  %vm519_vm1 = vcmp.ge.s32.totalorder %v1059_v7, 6 }
 0x1cf   :  { %v256_v62 = vsel %vm95_vm2, %v250_v58, %v254_v61  ;;  %v258_v63 = vsel %vm95_vm2, %v254_v61, %v250_v58  ;;  %866 = vmatpush1.msk.msra.mxu1 %vm109_vm3, %v273_v60  ;;  %vm495_vm3 = vcmp.lt.s32.totalorder %v1059_v7, 8 }
 0x1d0   :  { %v234_v0 = vpop.permute.xlu1 %233  ;;  %867 = vmatprep.subr.msk.mxu1 %vm99_vm4, %v256_v62 }
 0x1d1   :  { %868 = vmatpush1.msk.msra.mxu1 %vm98_vm6, %v258_v63 }
 0x1d2   :  { %v238_v4 = vpop.permute.xlu0 %237  ;;  %869 = vmatprep.subr.msk.mxu1 %vm99_vm4, %v255_v1 }
 0x1d3   :  { %v240_v5 = vsel %vm84_vm5, %v234_v0, %v238_v4  ;;  %v242_v6 = vsel %vm84_vm5, %v238_v4, %v234_v0  ;;  %870 = vmatpush1.msk.msra.mxu1 %vm98_vm6, %v257_v3  ;;  %vm501_vm5 = vcmp.ge.s32.totalorder %v1062_v9, 8 }
 0x1d4   :  { %v218_v8 = vpop.permute.xlu1 %217  ;;  %871 = vmatprep.subr.msk.mxu1 %vm88_vm7, %v240_v5 }
 0x1d5   :  { %872 = vmatpush1.msk.msra.mxu1 %vm87_vm8, %v242_v6 }
 0x1d6   :  { %v222_v12 = vpop.permute.xlu0 %221  ;;  %873 = vmatprep.subr.msk.mxu1 %vm88_vm7, %v239_v10  ;;  %vm500_vm7 = vcmp.ge.s32.totalorder %v1059_v7, 8 }
 0x1d7   :  { %v224_v13 = vsel %vm48_vm9, %v218_v8, %v222_v12  ;;  %v226_v14 = vsel %vm48_vm9, %v222_v12, %v218_v8  ;;  %874 = vmatpush1.msk.msra.mxu1 %vm87_vm8, %v241_v11 }
 0x1d8   :  { %875 = vmatprep.subr.msk.mxu1 %vm77_vm10, %v224_v13  ;;  %v216_v15 = vpop.permute.xlu1 %215 }
 0x1d9   :  { %876 = vmatpush1.msk.msra.mxu1 %vm76_vm11, %v226_v14 }
 0x1da   :  { %v220_v16 = vpop.permute.xlu0 %219 }
 0x1db   :  { %v223_v17 = vsel %vm48_vm9, %v216_v15, %v220_v16  ;;  %v225_v18 = vsel %vm48_vm9, %v220_v16, %v216_v15 }
 0x1dc   :  { %877 = vmatprep.subr.msk.mxu1 %vm77_vm10, %v223_v17 }
 0x1dd   :  { %878 = vmatpush1.msk.msra.mxu1 %vm76_vm11, %v225_v18 }
 0x1de   :  { %879 = vmatmul.mubr.msk.f32.vlgmr.msra.gmra.mxu1 %vm293_vm14, %v279_v19 }
 0x1df   :  { %370 = vmatprep.mubr.f32.mxu1 %v955_v2 }
 0x1e2   :  { %880 = vmatmul.mubr.msk.f32.gmra.mxu1 %vm293_vm14, %v280_v20 }
 0x1e3   :  { %806 = vmatprep.mubr.f32.mxu1 %v955_v2 }
 0x1e5   :  { %v291_v24 = vpop.permute.xlu1 %290 }
 0x1e7   :  { %v286_v22 = vpop.permute.xlu0 %285 }
 0x1e9   :  { %v393_v34 = vpop.permute.xlu1 %392 }
 0x1ea   :  { %v475_v45 = vadd.f32 %v474_v28, %v393_v34  ;;  %v477_v46 = vadd.f32 %v476_v39, %v393_v34 }
 0x1eb   :  { %v388_v25 = vpop.permute.xlu0 %387 }
 0x1ec   :  { %v469_v30 = vadd.f32 %v468_v21, %v388_v25  ;;  %v471_v35 = vadd.f32 %v470_v23, %v388_v25 }
 0x29e   :  { %v366_v26 = vpop.f32.mrf.mxu1 }
 0x29f   :  { %v367_v27 = vadd.f32 %v366_v26, %v286_v22  ;;  %v557_v26 = vld [vmem:[%s1467_s7] sm:$0xff] }
 0x2a0   :  { %v368_v29 = vpop.f32.mrf.mxu1 }
 0x2a1   :  { %v377_v31 = vmax.f32 %v367_v27, 0.0  ;;  %v369_v32 = vadd.f32 %v368_v29, %v286_v22  ;;  %v558_v27 = vld [vmem:[%s1467_s7 + $0x8] sm:$0xff] }
 0x2a2   :  { %v372_v33 = vpop.f32.mrf.mxu1 }
 0x2a3   :  { %v479_v36 = vadd.f32 %v469_v30, %v377_v31  ;;  %v378_v37 = vmax.f32 %v369_v32, 0.0  ;;  %v373_v38 = vadd.f32 %v372_v33, %v291_v24 }
 0x2a4   :  { %v374_v40 = vpop.f32.mrf.mxu1 }
 0x2a5   :  { %v1228_v41 = vmax.f32 %v479_v36, 0.0  ;;  %v480_v42 = vadd.f32 %v471_v35, %v378_v37  ;;  %v379_v43 = vmax.f32 %v373_v38, 0.0  ;;  %v375_v44 = vadd.f32 %v374_v40, %v291_v24 }
 0x2a7   :  { %v1230_v47 = vmax.f32 %v480_v42, 0.0  ;;  %v380_v48 = vmax.f32 %v375_v44, 0.0  ;;  %541 = vrot.lane.b32.xlu1 %v1228_v41, %s953_s19  ;;  %v481_v49 = vadd.f32 %v475_v45, %v379_v43  ;;  %v724_v43 = vld [vmem:[%s1470_s10] sm:$0xff]  ;;  %v725_v44 = vld [vmem:[%s1470_s10 + $0x8] sm:$0xff] }
 0x2a9   :  { %v482_v50 = vadd.f32 %v477_v46, %v380_v48  ;;  %545 = vrot.lane.b32.xlu0 %v1230_v47, %s953_s19  ;;  %v1240_v52 = vmax.f32 %v481_v49, 0.0 }
 0x2ab   :  { %v1236_v51 = vmax.f32 %v482_v50, 0.0  ;;  %525 = vrot.lane.b32.xlu1 %v1228_v41, %s958_s23 }
 0x2ad   :  { %589 = vmatprep.subr.mxu0 %v1236_v51  ;;  %529 = vrot.lane.b32.xlu0 %v1230_v47, %s958_s23 }
 0x2ae   :  { %590 = vmatpush1.msra.mxu0 %v1240_v52 }
 0x2af   :  { %591 = vmatprep.subr.mxu0 %v1230_v47  ;;  %506 = vrot.lane.b32.xlu1 %v1228_v41, %s959_s3 }
 0x2b0   :  { %592 = vmatpush1.msra.mxu0 %v1228_v41 }
 0x2b1   :  { %510 = vrot.lane.b32.xlu0 %v1230_v47, %s959_s3 }
 0x2b3   :  { %543 = vrot.lane.b32.xlu1 %v1240_v52, %s953_s19 }
 0x2b5   :  { %547 = vrot.lane.b32.xlu0 %v1236_v51, %s953_s19 }
 0x2b7   :  { %527 = vrot.lane.b32.xlu1 %v1240_v52, %s958_s23 }
 0x2b9   :  { %531 = vrot.lane.b32.xlu0 %v1236_v51, %s958_s23 }
 0x2bb   :  { %508 = vrot.lane.b32.xlu1 %v1240_v52, %s959_s3 }
 0x2bd   :  { %512 = vrot.lane.b32.xlu0 %v1236_v51, %s959_s3 }
 0x2bf   :  { %489 = vrot.lane.b32.xlu1 %v1240_v52, %s960_s25 }
 0x2c1   :  { %493 = vrot.lane.b32.xlu0 %v1236_v51, %s960_s25 }
 0x2c3   :  { %487 = vrot.lane.b32.xlu1 %v1228_v41, %s960_s25 }
 0x2c5   :  { %491 = vrot.lane.b32.xlu0 %v1230_v47, %s960_s25 }
 0x2c7   :  { %568 = vperm.xlu1 %930, %v560_v53  }
 0x2c9   :  { %563 = vperm.xlu0 %929, %v559_v54  }
 0x319   :  { %v542_v55 = vpop.permute.xlu1 %541 }
 0x31b   :  { %v546_v56 = vpop.permute.xlu0 %545 }
 0x31c   :  { %v549_v3 = vsel %vm95_vm2, %v542_v55, %v546_v56  ;;  %v551_v4 = vsel %vm95_vm2, %v546_v56, %v542_v55 }
 0x31d   :  { %v526_v57 = vpop.permute.xlu1 %525 }
 0x31f   :  { %v530_v58 = vpop.permute.xlu0 %529 }
 0x320   :  { %v533_v11 = vsel %vm48_vm9, %v526_v57, %v530_v58  ;;  %v535_v12 = vsel %vm48_vm9, %v530_v58, %v526_v57 }
 0x321   :  { %v507_v59 = vpop.permute.xlu1 %506 }
 0x323   :  { %v511_v60 = vpop.permute.xlu0 %510 }
 0x324   :  { %v515_v17 = vsel %vm514_vm0, %v507_v59, %v511_v60  ;;  %v517_v18 = vsel %vm514_vm0, %v511_v60, %v507_v59 }
 0x325   :  { %v544_v61 = vpop.permute.xlu1 %543 }
 0x327   :  { %v548_v62 = vpop.permute.xlu0 %547 }
 0x328   :  { %v550_v63 = vsel %vm95_vm2, %v544_v61, %v548_v62  ;;  %v552_v0 = vsel %vm95_vm2, %v548_v62, %v544_v61 }
 0x329   :  { %v528_v1 = vpop.permute.xlu1 %527  ;;  %883 = vmatprep.subr.msk.mxu0 %vm99_vm4, %v550_v63 }
 0x32a   :  { %884 = vmatpush1.msk.msra.mxu0 %vm98_vm6, %v552_v0 }
 0x32b   :  { %v532_v5 = vpop.permute.xlu0 %531  ;;  %885 = vmatprep.subr.msk.mxu0 %vm99_vm4, %v549_v3 }
 0x32c   :  { %v534_v6 = vsel %vm48_vm9, %v528_v1, %v532_v5  ;;  %v536_v8 = vsel %vm48_vm9, %v532_v5, %v528_v1  ;;  %886 = vmatpush1.msk.msra.mxu0 %vm98_vm6, %v551_v4 }
 0x32d   :  { %v509_v10 = vpop.permute.xlu1 %508  ;;  %887 = vmatprep.subr.msk.mxu0 %vm77_vm10, %v534_v6 }
 0x32e   :  { %888 = vmatpush1.msk.msra.mxu0 %vm76_vm11, %v536_v8 }
 0x32f   :  { %v513_v13 = vpop.permute.xlu0 %512  ;;  %889 = vmatprep.subr.msk.mxu0 %vm77_vm10, %v533_v11 }
 0x330   :  { %v516_v14 = vsel %vm514_vm0, %v509_v10, %v513_v13  ;;  %v518_v15 = vsel %vm514_vm0, %v513_v13, %v509_v10  ;;  %890 = vmatpush1.msk.msra.mxu0 %vm76_vm11, %v535_v12 }
 0x331   :  { %v490_v16 = vpop.permute.xlu1 %489  ;;  %891 = vmatprep.subr.msk.mxu0 %vm520_vm15, %v516_v14 }
 0x332   :  { %892 = vmatpush1.msk.msra.mxu0 %vm519_vm1, %v518_v15 }
 0x333   :  { %v494_v19 = vpop.permute.xlu0 %493  ;;  %893 = vmatprep.subr.msk.mxu0 %vm520_vm15, %v515_v17 }
 0x334   :  { %v497_v20 = vsel %vm495_vm3, %v490_v16, %v494_v19  ;;  %v499_v21 = vsel %vm495_vm3, %v494_v19, %v490_v16  ;;  %894 = vmatpush1.msk.msra.mxu0 %vm519_vm1, %v517_v18  ;;  %v722_v19 = vld [vmem:[%s1469_s9] sm:$0xff] }
 0x335   :  { %895 = vmatprep.subr.msk.mxu0 %vm501_vm5, %v497_v20  ;;  %v488_v22 = vpop.permute.xlu1 %487  ;;  %v723_v20 = vld [vmem:[%s1469_s9 + $0x8] sm:$0xff]  ;;  %s961_s9 = smov [#allocation2]  }
 0x336   :  { %896 = vmatpush1.msk.msra.mxu0 %vm500_vm7, %v499_v21  ;;  %s841_s5 = sshll.u32 %s961_s9, 4  ;;  %s842_s5 = int_to_ptr.vmem [resolvable:$true] %s841_s5 }
 0x337   :  { %v492_v23 = vpop.permute.xlu0 %491  ;;  %s931_s16 = scalar_lea.vmem %s842_s5, 512  ;;  %p936_p1 = scmp.lt.s32.totalorder %s842_s5, %s842_s5 }
 0x338   :  { %v496_v24 = vsel %vm495_vm3, %v488_v22, %v492_v23  ;;  %v498_v25 = vsel %vm495_vm3, %v492_v23, %v488_v22  ;;  %p932_p0 = scmp.ne.s32.totalorder %s842_s5, %s931_s16  ;;  %p937_p2 = scmp.lt.s32.totalorder %s931_s16, %s931_s16 }
 0x339   :  { %897 = vmatprep.subr.msk.mxu0 %vm501_vm5, %v496_v24 }
 0x33a   :  { %898 = vmatpush1.msk.msra.mxu0 %vm500_vm7, %v498_v25  ;;  %p938_p3 = por %p937_p2, %p936_p1 }
 0x33b   :  { %899 = vmatmul.mubr.msk.f32.vlgmr.msra.gmra.mxu0 %vm293_vm14, %v557_v26 }
 0x33c   :  { %647 = vmatprep.mubr.f32.mxu0 %v955_v2  ;;  %p939_p4 = pnand %p938_p3, %p932_p0 }
 0x33f   :  { %900 = vmatmul.mubr.msk.f32.gmra.mxu0 %vm293_vm14, %v558_v27 }
 0x342   :  { %v569_v35 = vpop.permute.xlu1 %568 }
 0x344   :  { %v564_v28 = vpop.permute.xlu0 %563 }
 0x3fb   :  { %v643_v29 = vpop.f32.mrf.mxu0 }
 0x3fc   :  { %v644_v30 = vadd.f32 %v643_v29, %v564_v28 }
 0x3fd   :  { %v645_v31 = vpop.f32.mrf.mxu0 }
 0x3fe   :  { %v654_v32 = vmax.f32 %v644_v30, 0.0  ;;  %v646_v33 = vadd.f32 %v645_v31, %v564_v28 }
 0x3ff   :  { %v649_v34 = vpop.f32.mrf.mxu0 }
 0x400   :  { %v655_v36 = vmax.f32 %v646_v33, 0.0  ;;  %706 = vrot.lane.b32.xlu1 %v654_v32, %s953_s19  ;;  %v650_v37 = vadd.f32 %v649_v34, %v569_v35 }
 0x401   :  { %v651_v38 = vpop.f32.mrf.mxu0 }
 0x402   :  { %v652_v39 = vadd.f32 %v651_v38, %v569_v35  ;;  %710 = vrot.lane.b32.xlu0 %v655_v36, %s953_s19  ;;  %v656_v42 = vmax.f32 %v650_v37, 0.0 }
 0x404   :  { %v657_v40 = vmax.f32 %v652_v39, 0.0  ;;  %690 = vrot.lane.b32.xlu1 %v654_v32, %s958_s23 }
 0x406   :  { %754 = vmatprep.subr.mxu1 %v657_v40  ;;  %694 = vrot.lane.b32.xlu0 %v655_v36, %s958_s23 }
 0x407   :  { %755 = vmatpush1.msra.mxu1 %v656_v42 }
 0x408   :  { %756 = vmatprep.subr.mxu1 %v655_v36  ;;  %674 = vrot.lane.b32.xlu1 %v654_v32, %s959_s3 }
 0x409   :  { %757 = vmatpush1.msra.mxu1 %v654_v32 }
 0x40a   :  { %678 = vrot.lane.b32.xlu0 %v655_v36, %s959_s3 }
 0x40c   :  { %708 = vrot.lane.b32.xlu1 %v656_v42, %s953_s19 }
 0x40e   :  { %712 = vrot.lane.b32.xlu0 %v657_v40, %s953_s19 }
 0x410   :  { %692 = vrot.lane.b32.xlu1 %v656_v42, %s958_s23 }
 0x412   :  { %696 = vrot.lane.b32.xlu0 %v657_v40, %s958_s23 }
 0x414   :  { %676 = vrot.lane.b32.xlu1 %v656_v42, %s959_s3 }
 0x416   :  { %680 = vrot.lane.b32.xlu0 %v657_v40, %s959_s3 }
 0x418   :  { %660 = vrot.lane.b32.xlu1 %v656_v42, %s960_s25 }
 0x41a   :  { %664 = vrot.lane.b32.xlu0 %v657_v40, %s960_s25 }
 0x41c   :  { %658 = vrot.lane.b32.xlu1 %v654_v32, %s960_s25 }
 0x41e   :  { %662 = vrot.lane.b32.xlu0 %v655_v36, %s960_s25 }
 0x420   :  { %728 = vperm.xlu1 %930, %v724_v43  }
 0x422   :  { %733 = vperm.xlu0 %929, %v725_v44  }
 0x472   :  { %v707_v45 = vpop.permute.xlu1 %706 }
 0x474   :  { %v711_v46 = vpop.permute.xlu0 %710 }
 0x475   :  { %v714_v59 = vsel %vm95_vm2, %v707_v45, %v711_v46  ;;  %v716_v60 = vsel %vm95_vm2, %v711_v46, %v707_v45 }
 0x476   :  { %v691_v48 = vpop.permute.xlu1 %690 }
 0x478   :  { %v695_v49 = vpop.permute.xlu0 %694 }
 0x479   :  { %v698_v1 = vsel %vm48_vm9, %v691_v48, %v695_v49  ;;  %v700_v3 = vsel %vm48_vm9, %v695_v49, %v691_v48 }
 0x47a   :  { %v675_v50 = vpop.permute.xlu1 %674 }
 0x47c   :  { %v679_v53 = vpop.permute.xlu0 %678 }
 0x47d   :  { %v682_v10 = vsel %vm514_vm0, %v675_v50, %v679_v53  ;;  %v684_v11 = vsel %vm514_vm0, %v679_v53, %v675_v50 }
 0x47e   :  { %v709_v54 = vpop.permute.xlu1 %708 }
 0x480   :  { %v713_v55 = vpop.permute.xlu0 %712 }
 0x481   :  { %v715_v56 = vsel %vm95_vm2, %v709_v54, %v713_v55  ;;  %v717_v57 = vsel %vm95_vm2, %v713_v55, %v709_v54 }
 0x482   :  { %v693_v58 = vpop.permute.xlu1 %692  ;;  %901 = vmatprep.subr.msk.mxu1 %vm99_vm4, %v715_v56 }
 0x483   :  { %902 = vmatpush1.msk.msra.mxu1 %vm98_vm6, %v717_v57 }
 0x484   :  { %v697_v61 = vpop.permute.xlu0 %696  ;;  %903 = vmatprep.subr.msk.mxu1 %vm99_vm4, %v714_v59 }
 0x485   :  { %v699_v62 = vsel %vm48_vm9, %v693_v58, %v697_v61  ;;  %v701_v63 = vsel %vm48_vm9, %v697_v61, %v693_v58  ;;  %904 = vmatpush1.msk.msra.mxu1 %vm98_vm6, %v716_v60 }
 0x486   :  { %v677_v0 = vpop.permute.xlu1 %676  ;;  %905 = vmatprep.subr.msk.mxu1 %vm77_vm10, %v699_v62 }
 0x487   :  { %906 = vmatpush1.msk.msra.mxu1 %vm76_vm11, %v701_v63 }
 0x488   :  { %v681_v4 = vpop.permute.xlu0 %680  ;;  %907 = vmatprep.subr.msk.mxu1 %vm77_vm10, %v698_v1 }
 0x489   :  { %v683_v5 = vsel %vm514_vm0, %v677_v0, %v681_v4  ;;  %v685_v6 = vsel %vm514_vm0, %v681_v4, %v677_v0  ;;  %908 = vmatpush1.msk.msra.mxu1 %vm76_vm11, %v700_v3 }
 0x48a   :  { %v661_v8 = vpop.permute.xlu1 %660  ;;  %909 = vmatprep.subr.msk.mxu1 %vm520_vm15, %v683_v5 }
 0x48b   :  { %910 = vmatpush1.msk.msra.mxu1 %vm519_vm1, %v685_v6 }
 0x48c   :  { %v665_v12 = vpop.permute.xlu0 %664  ;;  %911 = vmatprep.subr.msk.mxu1 %vm520_vm15, %v682_v10 }
 0x48d   :  { %v667_v13 = vsel %vm495_vm3, %v661_v8, %v665_v12  ;;  %v669_v14 = vsel %vm495_vm3, %v665_v12, %v661_v8  ;;  %912 = vmatpush1.msk.msra.mxu1 %vm519_vm1, %v684_v11 }
 0x48e   :  { %913 = vmatprep.subr.msk.mxu1 %vm501_vm5, %v667_v13  ;;  %v659_v15 = vpop.permute.xlu1 %658 }
 0x48f   :  { %914 = vmatpush1.msk.msra.mxu1 %vm500_vm7, %v669_v14 }
 0x490   :  { %v663_v16 = vpop.permute.xlu0 %662 }
 0x491   :  { %v666_v17 = vsel %vm495_vm3, %v659_v15, %v663_v16  ;;  %v668_v18 = vsel %vm495_vm3, %v663_v16, %v659_v15 }
 0x492   :  { %915 = vmatprep.subr.msk.mxu1 %vm501_vm5, %v666_v17 }
 0x493   :  { %916 = vmatpush1.msk.msra.mxu1 %vm500_vm7, %v668_v18 }
 0x494   :  { %917 = vmatmul.mubr.msk.f32.vlgmr.msra.gmra.mxu1 %vm293_vm14, %v722_v19 }
 0x495   :  { %812 = vmatprep.mubr.f32.mxu1 %v955_v2 }
 0x498   :  { %918 = vmatmul.mubr.msk.f32.gmra.mxu1 %vm293_vm14, %v723_v20 }
 0x49b   :  { %v729_v21 = vpop.permute.xlu1 %728 }
 0x49d   :  { %v734_v26 = vpop.permute.xlu0 %733 }
 0x554   :  { %v808_v22 = vpop.f32.mrf.mxu1 }
 0x555   :  { %v809_v23 = vadd.f32 %v808_v22, %v729_v21 }
 0x556   :  { %v810_v24 = vpop.f32.mrf.mxu1 }
 0x557   :  { %v819_v25 = vmax.f32 %v809_v23, 0.0  ;;  %v811_v9 = vadd.f32 %v810_v24, %v729_v21 }
 0x558   :  { %v814_v27 = vpop.f32.mrf.mxu1 }
 0x559   :  { %v823_v7 = vadd.f32 %v819_v25, %v1228_v41  ;;  %v820_v28 = vmax.f32 %v811_v9, 0.0  ;;  %v815_v29 = vadd.f32 %v814_v27, %v734_v26 }
 0x55a   :  { %v816_v30 = vpop.f32.mrf.mxu1 }
 0x55b   :  { %v827_v2 = vmax.f32 %v823_v7, 0.0  ;;  %v824_v31 = vadd.f32 %v820_v28, %v1230_v47  ;;  %v821_v32 = vmax.f32 %v815_v29, 0.0  ;;  %v817_v33 = vadd.f32 %v816_v30, %v734_v26 }
 0x55d   :  { %831 = vst [vmem:[#allocation2] sm:$0xff] %v827_v2  ;;  %v828_v34 = vmax.f32 %v824_v31, 0.0  ;;  %v825_v35 = vadd.f32 %v821_v32, %v1240_v52  ;;  %v822_v36 = vmax.f32 %v817_v33, 0.0 }
 0x55f   :  { %834 = vst [vmem:[#allocation2 + $0x10] sm:$0xff] %v828_v34  ;;  %v829_v37 = vmax.f32 %v825_v35, 0.0  ;;  %v826_v38 = vadd.f32 %v822_v36, %v1236_v51 }
 0x561   :  { %832 = vst [vmem:[#allocation2 + $0x8] sm:$0xff] %v829_v37  ;;  %v830_v41 = vmax.f32 %v826_v38, 0.0 }
 0x563   :  { %835 = vst [vmem:[#allocation2 + $0x18] sm:$0xff] %v830_v41 }
 0x564   :  { %942 = shalt.err (!%p939_p4)
}
 0x565   :  { %s962_s17 = smov 128  }
 0x566   :  { %847 = dma.vmem_to_hbm [thread:$0]  %s842_s5, 512, %s1471_s11, [#allocation3], %s962_s17, %s962_s17, %s960_s25  }
 0x567   :  { %951 = dma.done.wait [#allocation3], 512  }
 0x568   :  { %952 = vsyncadd [#allocation3], 4294966784 }
 0x569   :  { %851 = vsyncpa [#allocation3], 1 }

</bundles_post_ra>
